<compile_context>
chip_gen: v7x
topology: tpu7x:2x2x1
jax: 0.10.0
libtpu: 0.0.40
codegen_flags: <defaults>
</compile_context>

<pallas_src>
import functools

import jax
import jax.numpy as jnp
from jax.experimental import pallas as pl
from jax.experimental.pallas import tpu as pltpu


LANE = 128          # lane width: pad all feature dims to a multiple of this
DEFAULT_B_TILE = 256  # batch rows per grid step (multiple of 8 sublanes)


def _round_up(x, m):
    return ((x + m - 1) // m) * m


def _qnet_kernel(x_ref, w1_ref, b1_ref, w2_ref, b2_ref, w3_ref, b3_ref, o_ref):
    """One batch tile: 3 matmuls (bf16 in, f32 acc) + bias + ReLU, fully fused."""
    x = x_ref[...]  # (B_TILE, IN_P) bf16

    # layer 1: Linear + ReLU   (f32 accumulate, f32 VPU math)
    h1 = jnp.dot(x, w1_ref[...], preferred_element_type=jnp.float32)
    h1 = jnp.maximum(h1 + b1_ref[...], 0.0).astype(jnp.bfloat16)

    # layer 2: Linear + ReLU
    h2 = jnp.dot(h1, w2_ref[...], preferred_element_type=jnp.float32)
    h2 = jnp.maximum(h2 + b2_ref[...], 0.0).astype(jnp.bfloat16)

    # layer 3: Linear (no activation)
    out = jnp.dot(h2, w3_ref[...], preferred_element_type=jnp.float32)
    o_ref[...] = (out + b3_ref[...]).astype(o_ref.dtype)


@functools.partial(jax.jit, static_argnames=("b_tile",))
def linear_qnet_forward(x, params, *, b_tile=DEFAULT_B_TILE):
    """x: (B, input_size) float32; params: dict of w1,b1,w2,b2,w3,b3 (f32,
    stored as (fan_in, fan_out) / (1, fan_out)). Returns (B, output_size) f32."""
    w1, b1 = params["w1"], params["b1"]
    w2, b2 = params["w2"], params["b2"]
    w3, b3 = params["w3"], params["b3"]

    B, in_size = x.shape
    hid_size = w1.shape[1]
    out_size = w3.shape[1]

    # Lane-dense padded sizes.
    in_p = _round_up(in_size, LANE)
    hid_p = _round_up(hid_size, LANE)
    out_p = _round_up(out_size, LANE)

    # Batch tiling: pad B up to a multiple of 8 sublanes; shrink the tile for
    # tiny batches, otherwise pad B up to a multiple of the tile.
    b_pad = _round_up(B, 8)
    if b_pad < b_tile:
        tile = b_pad
    else:
        tile = b_tile
        b_pad = _round_up(B, tile)
    grid = (b_pad // tile,)

    f32 = jnp.float32

    # Zero-pad operands (zeros in padded rows/cols keep the math exact) and
    # cast matmul operands to bf16 (MXU-native); biases stay f32.
    xp = jnp.pad(x.astype(f32), ((0, b_pad - B), (0, in_p - in_size))).astype(jnp.bfloat16)
    w1p = jnp.pad(w1, ((0, in_p - in_size), (0, hid_p - hid_size))).astype(jnp.bfloat16)
    w2p = jnp.pad(w2, ((0, hid_p - hid_size), (0, hid_p - hid_size))).astype(jnp.bfloat16)
    w3p = jnp.pad(w3, ((0, hid_p - hid_size), (0, out_p - out_size))).astype(jnp.bfloat16)
    b1p = jnp.pad(b1, ((0, 0), (0, hid_p - hid_size))).astype(f32)
    b2p = jnp.pad(b2, ((0, 0), (0, hid_p - hid_size))).astype(f32)
    b3p = jnp.pad(b3, ((0, 0), (0, out_p - out_size))).astype(f32)

    # Weights/biases: whole-array blocks, same block every grid step -> they
    # are loaded into VMEM once and stay resident while x / out stream.
    resident = lambda a: pl.BlockSpec(a.shape, lambda i: (0, 0))

    out_padded = pl.pallas_call(
        _qnet_kernel,
        out_shape=jax.ShapeDtypeStruct((b_pad, out_p), f32),
        grid=grid,
        in_specs=[
            pl.BlockSpec((tile, in_p), lambda i: (i, 0)),   # x streams over batch
            resident(w1p), resident(b1p),
            resident(w2p), resident(b2p),
            resident(w3p), resident(b3p),
        ],
        out_specs=pl.BlockSpec((tile, out_p), lambda i: (i, 0)),  # lane-dense slab
        compiler_params=pltpu.CompilerParams(
            dimension_semantics=("parallel",),   # batch steps are independent (v7x 2-TC)
            vmem_limit_bytes=32 * 1024 * 1024,
        ),
    )(xp, w1p, b1p, w2p, b2p, w3p, b3p)

    # Slice the real result back out of the lane/batch-padded slab.
    return out_padded[:B, :out_size]


def init_params(key, input_size, hidden_size, output_size):
    """Deterministic init mimicking nn.Linear's U(-1/sqrt(fan_in), 1/sqrt(fan_in))."""
    ks = jax.random.split(key, 6)

    def linear(kw, kb, fan_in, fan_out):
        bound = 1.0 / jnp.sqrt(jnp.float32(fan_in))
        # stored as (fan_in, fan_out) == W^T relative to PyTorch's (out, in)
        w = jax.random.uniform(kw, (fan_in, fan_out), jnp.float32, -bound, bound)
        b = jax.random.uniform(kb, (1, fan_out), jnp.float32, -bound, bound)
        return w, b

    w1, b1 = linear(ks[0], ks[1], input_size, hidden_size)
    w2, b2 = linear(ks[2], ks[3], hidden_size, hidden_size)
    w3, b3 = linear(ks[4], ks[5], hidden_size, output_size)
    return {"w1": w1, "b1": b1, "w2": w2, "b2": b2, "w3": w3, "b3": b3}


def reference_forward(x, p):
    h1 = jnp.maximum(x @ p["w1"] + p["b1"], 0.0)
    h2 = jnp.maximum(h1 @ p["w2"] + p["b2"], 0.0)
    return h2 @ p["w3"] + p["b3"]


if __name__ == "__main__":
    # Small shapes consistent with the module (snake-game Q-net sizes).
    batch, input_size, hidden_size, output_size = 2, 16, 32, 4

    key = jax.random.PRNGKey(0)
    k_x, k_p = jax.random.split(key)
    x = jax.random.normal(k_x, (batch, input_size), jnp.float32)
    params = init_params(k_p, input_size, hidden_size, output_size)

    out = linear_qnet_forward(x, params)
    out = jax.block_until_ready(out)

    ref = reference_forward(x, params)
    assert out.shape == (batch, output_size)
    # bf16 matmul operands with f32 accumulation -> ~1e-2 relative agreement.
    assert jnp.allclose(out, ref, atol=2e-2, rtol=2e-2), (
        f"max abs err {jnp.max(jnp.abs(out - ref))}")

    print("KERNEL_OK")
</pallas_src>

<mosaic_0001>
module attributes {stable_mosaic.version = 11 : i64} {
  func.func @_qnet_kernel(%arg0: i32, %arg1: memref<8x128xbf16, #tpu.memory_space<vmem>>, %arg2: memref<128x128xbf16, #tpu.memory_space<vmem>>, %arg3: memref<1x128xf32, #tpu.memory_space<vmem>>, %arg4: memref<128x128xbf16, #tpu.memory_space<vmem>>, %arg5: memref<1x128xf32, #tpu.memory_space<vmem>>, %arg6: memref<128x128xbf16, #tpu.memory_space<vmem>>, %arg7: memref<1x128xf32, #tpu.memory_space<vmem>>, %arg8: memref<8x128xf32, #tpu.memory_space<vmem>>) attributes {dimension_semantics = [#tpu.dimension_semantics<parallel>], iteration_bounds = array<i64: 1>, scalar_prefetch = 0 : i64, scratch_operands = 0 : i64, tpu.core_type = #tpu.core_type<tc>, window_params = [{transform_indices = @transform_0, window_bounds = array<i64: 8, 128>}, {pipeline_mode = #tpu.pipeline_mode<synchronous>, transform_indices = @transform_1, window_bounds = array<i64: 128, 128>}, {pipeline_mode = #tpu.pipeline_mode<synchronous>, transform_indices = @transform_2, window_bounds = array<i64: 1, 128>}, {pipeline_mode = #tpu.pipeline_mode<synchronous>, transform_indices = @transform_3, window_bounds = array<i64: 128, 128>}, {pipeline_mode = #tpu.pipeline_mode<synchronous>, transform_indices = @transform_4, window_bounds = array<i64: 1, 128>}, {pipeline_mode = #tpu.pipeline_mode<synchronous>, transform_indices = @transform_5, window_bounds = array<i64: 128, 128>}, {pipeline_mode = #tpu.pipeline_mode<synchronous>, transform_indices = @transform_6, window_bounds = array<i64: 1, 128>}, {transform_indices = @transform_7, window_bounds = array<i64: 8, 128>}]} {
    %c0 = arith.constant 0 : index
    %c0_0 = arith.constant 0 : index
    %0 = vector.load %arg1[%c0, %c0_0] : memref<8x128xbf16, #tpu.memory_space<vmem>>, vector<8x128xbf16>
    %c0_1 = arith.constant 0 : index
    %c0_2 = arith.constant 0 : index
    %1 = vector.load %arg2[%c0_1, %c0_2] : memref<128x128xbf16, #tpu.memory_space<vmem>>, vector<128x128xbf16>
    %cst = arith.constant dense<0.000000e+00> : vector<8x128xf32>
    %2 = tpu.matmul %0, %1, %cst {dimension_numbers = #tpu.dot_dimension_numbers<[1], [0], [0], [1], [0, 0, 1, 1], [], []>} : vector<8x128xbf16>, vector<128x128xbf16>, vector<8x128xf32> -> vector<8x128xf32>
    %c0_3 = arith.constant 0 : index
    %c0_4 = arith.constant 0 : index
    %3 = vector.load %arg3[%c0_3, %c0_4] : memref<1x128xf32, #tpu.memory_space<vmem>>, vector<1x128xf32>
    %4 = vector.broadcast %3 : vector<1x128xf32> to vector<8x128xf32>
    %5 = arith.addf %2, %4 : vector<8x128xf32>
    %cst_5 = arith.constant 0.000000e+00 : f32
    %6 = vector.broadcast %cst_5 : f32 to vector<8x128xf32>
    %7 = arith.maximumf %5, %6 : vector<8x128xf32>
    %8 = arith.truncf %7 : vector<8x128xf32> to vector<8x128xbf16>
    %c0_6 = arith.constant 0 : index
    %c0_7 = arith.constant 0 : index
    %9 = vector.load %arg4[%c0_6, %c0_7] : memref<128x128xbf16, #tpu.memory_space<vmem>>, vector<128x128xbf16>
    %cst_8 = arith.constant dense<0.000000e+00> : vector<8x128xf32>
    %10 = tpu.matmul %8, %9, %cst_8 {dimension_numbers = #tpu.dot_dimension_numbers<[1], [0], [0], [1], [0, 0, 1, 1], [], []>} : vector<8x128xbf16>, vector<128x128xbf16>, vector<8x128xf32> -> vector<8x128xf32>
    %c0_9 = arith.constant 0 : index
    %c0_10 = arith.constant 0 : index
    %11 = vector.load %arg5[%c0_9, %c0_10] : memref<1x128xf32, #tpu.memory_space<vmem>>, vector<1x128xf32>
    %12 = vector.broadcast %11 : vector<1x128xf32> to vector<8x128xf32>
    %13 = arith.addf %10, %12 : vector<8x128xf32>
    %cst_11 = arith.constant 0.000000e+00 : f32
    %14 = vector.broadcast %cst_11 : f32 to vector<8x128xf32>
    %15 = arith.maximumf %13, %14 : vector<8x128xf32>
    %16 = arith.truncf %15 : vector<8x128xf32> to vector<8x128xbf16>
    %c0_12 = arith.constant 0 : index
    %c0_13 = arith.constant 0 : index
    %17 = vector.load %arg6[%c0_12, %c0_13] : memref<128x128xbf16, #tpu.memory_space<vmem>>, vector<128x128xbf16>
    %cst_14 = arith.constant dense<0.000000e+00> : vector<8x128xf32>
    %18 = tpu.matmul %16, %17, %cst_14 {dimension_numbers = #tpu.dot_dimension_numbers<[1], [0], [0], [1], [0, 0, 1, 1], [], []>} : vector<8x128xbf16>, vector<128x128xbf16>, vector<8x128xf32> -> vector<8x128xf32>
    %c0_15 = arith.constant 0 : index
    %c0_16 = arith.constant 0 : index
    %19 = vector.load %arg7[%c0_15, %c0_16] : memref<1x128xf32, #tpu.memory_space<vmem>>, vector<1x128xf32>
    %20 = vector.broadcast %19 : vector<1x128xf32> to vector<8x128xf32>
    %21 = arith.addf %18, %20 : vector<8x128xf32>
    %c0_17 = arith.constant 0 : index
    %c0_18 = arith.constant 0 : index
    %22 = vector.load %arg8[%c0_17, %c0_18] : memref<8x128xf32, #tpu.memory_space<vmem>>, vector<8x128xf32>
    tpu.vector_store %arg8[%c0_17, %c0_18], %21 {strides = array<i32>} : memref<8x128xf32, #tpu.memory_space<vmem>>, vector<8x128xf32>,
    return
  }
  func.func @transform_0(%arg0: i32) -> (i32, i32) {
    %c0_i32 = arith.constant 0 : i32
    %c0_i32_0 = arith.constant 0 : i32
    return %arg0, %c0_i32 : i32, i32
  }
  func.func @transform_1(%arg0: i32) -> (i32, i32) {
    %c0_i32 = arith.constant 0 : i32
    %c0_i32_0 = arith.constant 0 : i32
    %c0_i32_1 = arith.constant 0 : i32
    return %c0_i32, %c0_i32_0 : i32, i32
  }
  func.func @transform_2(%arg0: i32) -> (i32, i32) {
    %c0_i32 = arith.constant 0 : i32
    %c0_i32_0 = arith.constant 0 : i32
    %c0_i32_1 = arith.constant 0 : i32
    return %c0_i32, %c0_i32_0 : i32, i32
  }
  func.func @transform_3(%arg0: i32) -> (i32, i32) {
    %c0_i32 = arith.constant 0 : i32
    %c0_i32_0 = arith.constant 0 : i32
    %c0_i32_1 = arith.constant 0 : i32
    return %c0_i32, %c0_i32_0 : i32, i32
  }
  func.func @transform_4(%arg0: i32) -> (i32, i32) {
    %c0_i32 = arith.constant 0 : i32
    %c0_i32_0 = arith.constant 0 : i32
    %c0_i32_1 = arith.constant 0 : i32
    return %c0_i32, %c0_i32_0 : i32, i32
  }
  func.func @transform_5(%arg0: i32) -> (i32, i32) {
    %c0_i32 = arith.constant 0 : i32
    %c0_i32_0 = arith.constant 0 : i32
    %c0_i32_1 = arith.constant 0 : i32
    return %c0_i32, %c0_i32_0 : i32, i32
  }
  func.func @transform_6(%arg0: i32) -> (i32, i32) {
    %c0_i32 = arith.constant 0 : i32
    %c0_i32_0 = arith.constant 0 : i32
    %c0_i32_1 = arith.constant 0 : i32
    return %c0_i32, %c0_i32_0 : i32, i32
  }
  func.func @transform_7(%arg0: i32) -> (i32, i32) {
    %c0_i32 = arith.constant 0 : i32
    %c0_i32_0 = arith.constant 0 : i32
    return %arg0, %c0_i32 : i32, i32
  }
}

</mosaic_0001>

<bundles_post_ra>
// kernel: linear_qnet_forward.1
= control target key start
LH: loop header
LB: loop body
LE: loop exit
PB: predicated region body
PF: predicated region fallthrough
CT: control target
= control target key end

     0   :  { %v510_v0 = vmov 0.0   ;;  %vm511_vm0 = vmmov 0   ;;  %s669_s1 = inlined_call_operand.vmem [shape: bf16[128,128], index: 1, kind: input, shape index: {}]   ;;  %s670_s3 = inlined_call_operand.vmem [shape: bf16[128,128], index: 3, kind: input, shape index: {}]   ;;  %s671_s0 = inlined_call_operand.vmem [shape: bf16[8,128], index: 0, kind: input, shape index: {}]   ;;  %s672_s5 = inlined_call_operand.vmem [shape: bf16[128,128], index: 5, kind: input, shape index: {}]   ;;  %s673_s2 = inlined_call_operand.vmem [shape: f32[1,128], index: 2, kind: input, shape index: {}]   ;;  %s674_s4 = inlined_call_operand.vmem [shape: f32[1,128], index: 4, kind: input, shape index: {}]   ;;  %s675_s6 = inlined_call_operand.vmem [shape: f32[1,128], index: 6, kind: input, shape index: {}]   ;;  %s676_s7 = inlined_call_operand.vmem [shape: f32[8,128], index: 7, kind: output, shape index: {}]  }
   0x1   :  { %424 = vmatprep.subr.bf16.mxu0 %v510_v0  ;;  %v486_v1 = vld [vmem:[%s669_s1] sm:$0xff]   ;;  %440 = vmatprep.mubr.msk.bf16.mxu0 %vm511_vm0, %v510_v0  ;;  %v487_v2 = vld [vmem:[%s669_s1 + $0x8] sm:$0xff]   ;;  %v488_v3 = vld [vmem:[%s669_s1 + $0x10] sm:$0xff]  }
   0x2   :  { %444 = vmatprep.subr.bf16.mxu1 %v510_v0  ;;  %460 = vmatprep.mubr.msk.bf16.mxu1 %vm511_vm0, %v510_v0  ;;  %v494_v4 = vld [vmem:[%s670_s3] sm:$0xff]   ;;  %v489_v5 = vld [vmem:[%s669_s1 + $0x18] sm:$0xff]   ;;  %v495_v6 = vld [vmem:[%s670_s3 + $0x8] sm:$0xff]  }
   0x3   :  { %425 = vmatpush3.bf16.msra.mxu0 %v486_v1  ;;  %445 = vmatpush3.bf16.msra.mxu1 %v494_v4  ;;  %v490_v7 = vld [vmem:[%s669_s1 + $0x20] sm:$0xff]   ;;  %v496_v8 = vld [vmem:[%s670_s3 + $0x10] sm:$0xff]   ;;  %v491_v9 = vld [vmem:[%s669_s1 + $0x28] sm:$0xff]  }
   0x4   :  { %426 = vmatprep.subr.bf16.mxu0 %v510_v0  ;;  %446 = vmatprep.subr.bf16.mxu1 %v510_v0  ;;  %v497_v10 = vld [vmem:[%s670_s3 + $0x18] sm:$0xff]   ;;  %v492_v11 = vld [vmem:[%s669_s1 + $0x30] sm:$0xff]   ;;  %v498_v12 = vld [vmem:[%s670_s3 + $0x20] sm:$0xff]  }
   0x5   :  { %v493_v13 = vld [vmem:[%s669_s1 + $0x38] sm:$0xff]   ;;  %v499_v14 = vld [vmem:[%s670_s3 + $0x28] sm:$0xff]   ;;  %v27_v15 = vld [vmem:[%s671_s0] sm:$0xf] }
   0x6   :  { %v500_v16 = vld [vmem:[%s670_s3 + $0x30] sm:$0xff]   ;;  %v501_v17 = vld [vmem:[%s670_s3 + $0x38] sm:$0xff]   ;;  %v502_v18 = vld [vmem:[%s672_s5] sm:$0xff]  }
   0x7   :  { %427 = vmatpush3.bf16.msra.mxu0 %v487_v2  ;;  %447 = vmatpush3.bf16.msra.mxu1 %v495_v6  ;;  %v503_v19 = vld [vmem:[%s672_s5 + $0x8] sm:$0xff]   ;;  %v504_v20 = vld [vmem:[%s672_s5 + $0x10] sm:$0xff]   ;;  %v505_v21 = vld [vmem:[%s672_s5 + $0x18] sm:$0xff]  }
   0x8   :  { %428 = vmatprep.subr.bf16.mxu0 %v510_v0  ;;  %448 = vmatprep.subr.bf16.mxu1 %v510_v0  ;;  %v506_v22 = vld [vmem:[%s672_s5 + $0x20] sm:$0xff]   ;;  %v507_v23 = vld [vmem:[%s672_s5 + $0x28] sm:$0xff]   ;;  %v508_v32 = vld [vmem:[%s672_s5 + $0x30] sm:$0xff]  }
   0x9   :  { %v370_v24 = vld [vmem:[%s673_s2] ss:$0 sm:$0xff]  ;;  %v509_v33 = vld [vmem:[%s672_s5 + $0x38] sm:$0xff]  }
   0xa   :  { %v379_v34 = vld [vmem:[%s674_s4] ss:$0 sm:$0xff] }
   0xb   :  { %429 = vmatpush3.bf16.msra.mxu0 %v488_v3  ;;  %449 = vmatpush3.bf16.msra.mxu1 %v496_v8  ;;  %v388_v42 = vld [vmem:[%s675_s6] ss:$0 sm:$0xff] }
   0xc   :  { %430 = vmatprep.subr.bf16.mxu0 %v510_v0  ;;  %450 = vmatprep.subr.bf16.mxu1 %v510_v0 }
   0xf   :  { %431 = vmatpush3.bf16.msra.mxu0 %v489_v5  ;;  %451 = vmatpush3.bf16.msra.mxu1 %v497_v10 }
  0x10   :  { %432 = vmatprep.subr.bf16.mxu0 %v510_v0  ;;  %452 = vmatprep.subr.bf16.mxu1 %v510_v0 }
  0x13   :  { %433 = vmatpush3.bf16.msra.mxu0 %v490_v7  ;;  %453 = vmatpush3.bf16.msra.mxu1 %v498_v12 }
  0x14   :  { %434 = vmatprep.subr.bf16.mxu0 %v510_v0  ;;  %454 = vmatprep.subr.bf16.mxu1 %v510_v0 }
  0x17   :  { %435 = vmatpush3.bf16.msra.mxu0 %v491_v9  ;;  %455 = vmatpush3.bf16.msra.mxu1 %v499_v14 }
  0x18   :  { %436 = vmatprep.subr.bf16.mxu0 %v510_v0  ;;  %456 = vmatprep.subr.bf16.mxu1 %v510_v0 }
  0x1b   :  { %437 = vmatpush3.bf16.msra.mxu0 %v492_v11  ;;  %457 = vmatpush3.bf16.msra.mxu1 %v500_v16 }
  0x1c   :  { %438 = vmatprep.subr.bf16.mxu0 %v510_v0  ;;  %458 = vmatprep.subr.bf16.mxu1 %v510_v0 }
  0x1f   :  { %439 = vmatpush3.bf16.msra.mxu0 %v493_v13  ;;  %459 = vmatpush3.bf16.msra.mxu1 %v501_v17 }
  0x20   :  { %464 = vmatprep.subr.bf16.mxu0 %v510_v0 }
  0x22   :  { %441 = vmatmul.mubr.bf16.vlgmr.msra.gmra.mrb[0].mxu0 %v27_v15 }
  0x23   :  { %480 = vmatprep.mubr.msk.bf16.mxu0 %vm511_vm0, %v510_v0  ;;  %465 = vmatpush3.bf16.msra.mxu0 %v502_v18 }
  0x24   :  { %466 = vmatprep.subr.bf16.mxu0 %v510_v0 }
  0x27   :  { %467 = vmatpush3.bf16.msra.mxu0 %v503_v19 }
  0x28   :  { %468 = vmatprep.subr.bf16.mxu0 %v510_v0 }
  0x2b   :  { %469 = vmatpush3.bf16.msra.mxu0 %v504_v20 }
  0x2c   :  { %470 = vmatprep.subr.bf16.mxu0 %v510_v0 }
  0x2f   :  { %471 = vmatpush3.bf16.msra.mxu0 %v505_v21 }
  0x30   :  { %472 = vmatprep.subr.bf16.mxu0 %v510_v0 }
  0x33   :  { %473 = vmatpush3.bf16.msra.mxu0 %v506_v22 }
  0x34   :  { %474 = vmatprep.subr.bf16.mxu0 %v510_v0 }
  0x37   :  { %475 = vmatpush3.bf16.msra.mxu0 %v507_v23 }
  0x38   :  { %476 = vmatprep.subr.bf16.mxu0 %v510_v0 }
  0x3b   :  { %477 = vmatpush3.bf16.msra.mxu0 %v508_v32 }
  0x3c   :  { %478 = vmatprep.subr.bf16.mxu0 %v510_v0 }
  0x3f   :  { %479 = vmatpush3.bf16.msra.mxu0 %v509_v33 }
  0xf5   :  { %v133_v25 = vpop.f32.mrb[0].mxu0 }
  0xf6   :  { %v134_v26 = vadd.f32 %v370_v24, %v133_v25  ;;  %v442_v27 = vpop.f32.mrb[1].mxu0 }
  0xf7   :  { %v136_v28 = vpop.f32.mrb[2].mxu0 }
  0xf8   :  { %v139_v29 = vmax.f32 %v134_v26, 0.0  ;;  %v443_v30 = vpop.f32.mrb[3].mxu0 }
  0xfa   :  { %v140_v31 = vpack.c.bf16 %v139_v29, %v139_v29 }
  0xfc   :  { %461 = vmatmul.mubr.bf16.vlgmr.msra.gmra.mrb[0].mxu1 %v140_v31 }
 0x1cf   :  { %v246_v35 = vpop.f32.mrb[0].mxu1 }
 0x1d0   :  { %v247_v36 = vadd.f32 %v379_v34, %v246_v35  ;;  %v462_v37 = vpop.f32.mrb[1].mxu1 }
 0x1d1   :  { %v249_v38 = vpop.f32.mrb[2].mxu1 }
 0x1d2   :  { %v252_v39 = vmax.f32 %v247_v36, 0.0  ;;  %v463_v40 = vpop.f32.mrb[3].mxu1 }
 0x1d4   :  { %v253_v41 = vpack.c.bf16 %v252_v39, %v252_v39 }
 0x1d6   :  { %481 = vmatmul.mubr.bf16.vlgmr.msra.gmra.mrb[4].mxu0 %v253_v41 }
 0x2a9   :  { %v359_v43 = vpop.f32.mrb[4].mxu0 }
 0x2aa   :  { %v360_v44 = vadd.f32 %v388_v42, %v359_v43  ;;  %v482_v45 = vpop.f32.mrb[5].mxu0 }
 0x2ab   :  { %v362_v46 = vpop.f32.mrb[6].mxu0 }
 0x2ac   :  { %365 = vst [vmem:[%s676_s7] sm:$0xff] %v360_v44  ;;  %v483_v47 = vpop.f32.mrb[7].mxu0 }

</bundles_post_ra>
